<compile_context>
chip_gen: v7x
topology: tpu7x:2x2x1
jax: 0.10.0
libtpu: 0.0.40
codegen_flags: <defaults>
</compile_context>

<pallas_src>
import functools

import jax
import jax.numpy as jnp
from jax import lax
from jax.experimental import pallas as pl
from jax.experimental.pallas import tpu as pltpu

_LANES = 128


def _min_sublane(dtype) -> int:
    """Minimum sublane tile multiple for a dtype (f32:8, bf16/f16:16, 8-bit:32)."""
    itemsize = jnp.dtype(dtype).itemsize
    if itemsize >= 4:
        return 8
    if itemsize == 2:
        return 16
    return 32


def _round_up(x: int, m: int) -> int:
    return -(-x // m) * m


def _quantile_loss_kernel(p_ref, t_ref, o_ref, *, coef_abs, coef_lin,
                          rows_per_block, rows_valid, needs_mask):
    # Inputs arrive in their native (possibly bf16) dtype; upcast per block.
    e = t_ref[...].astype(jnp.float32) - p_ref[...].astype(jnp.float32)
    # sum_q max((q-1)e, q*e)  ==  coef_abs * |e| + coef_lin * e
    s = coef_abs * jnp.abs(e) + coef_lin * e
    if needs_mask:
        # Last grid block may extend past the array: zero rows >= rows_valid.
        # (Padded-but-in-range elements already contribute e == 0.)
        row0 = pl.program_id(0) * rows_per_block
        rows = lax.broadcasted_iota(jnp.int32, s.shape, 0) + row0
        s = jnp.where(rows < rows_valid, s, 0.0)
    # Lane-dense (1, 128) per-block partial sum -> grid axis stays "parallel".
    o_ref[...] = jnp.sum(s, axis=0, keepdims=True)


def quantile_loss(preds, target, quantiles, *, rows_per_block=4096):
    """Pallas TPU quantile (pinball) loss. Returns a scalar float32."""
    preds_f = jnp.ravel(preds)
    target_f = jnp.ravel(target)
    assert preds_f.shape == target_f.shape, "preds/target must have same #elements"

    n = int(preds_f.shape[0])
    sub = max(_min_sublane(preds_f.dtype), _min_sublane(target_f.dtype))

    rows_needed = -(-n // _LANES)                      # ceil(n / 128)
    rows_total = max(sub, _round_up(rows_needed, sub))  # pad rows to sublane tile
    n_small_pad = rows_total * _LANES

    if n_small_pad != n:
        # Tiny pad (< sub*128 elements) so the reshape is legal; padded slots give
        # e == 0 which contributes exactly 0.  Usually a no-op for typical sizes.
        preds_f = jnp.pad(preds_f, (0, n_small_pad - n))
        target_f = jnp.pad(target_f, (0, n_small_pad - n))

    preds_2d = preds_f.reshape(rows_total, _LANES)
    target_2d = target_f.reshape(rows_total, _LANES)

    # Block height: multiple of the dtype sublane tile, capped by the array, and
    # split so the grid has >= 2 blocks when possible (v7x megacore / full HBM BW).
    rpb = max(sub, (int(rows_per_block) // sub) * sub)
    if rows_total > sub and rows_total <= rpb:
        rpb = _round_up(-(-rows_total // 2), sub)
    rpb = min(rpb, rows_total)
    num_blocks = -(-rows_total // rpb)
    needs_mask = (rows_total % rpb) != 0               # only mask if last block is partial

    qs = [float(q) for q in quantiles]
    coef_pos = float(sum(qs))                 # sum_q q        (weight on max(e, 0))
    coef_neg = float(len(qs)) - coef_pos      # sum_q (1 - q)  (weight on max(-e, 0))
    coef_abs = 0.5 * (coef_pos + coef_neg)    # == K / 2
    coef_lin = 0.5 * (coef_pos - coef_neg)

    kernel = functools.partial(
        _quantile_loss_kernel,
        coef_abs=coef_abs,
        coef_lin=coef_lin,
        rows_per_block=rpb,
        rows_valid=rows_total,
        needs_mask=needs_mask,
    )

    partials = pl.pallas_call(
        kernel,
        out_shape=jax.ShapeDtypeStruct((num_blocks, _LANES), jnp.float32),
        grid_spec=pltpu.PrefetchScalarGridSpec(
            num_scalar_prefetch=0,
            grid=(num_blocks,),
            in_specs=[
                pl.BlockSpec((rpb, _LANES), lambda i: (i, 0)),
                pl.BlockSpec((rpb, _LANES), lambda i: (i, 0)),
            ],
            out_specs=pl.BlockSpec((1, _LANES), lambda i: (i, 0)),
        ),
        compiler_params=pltpu.CompilerParams(
            dimension_semantics=("parallel",),
            vmem_limit_bytes=32 * 1024 * 1024,
        ),
    )(preds_2d, target_2d)

    # Tiny final tree-reduce + mean over the true element count.
    return jnp.sum(partials) / jnp.float32(n)


def quantile_loss_ref(preds, target, quantiles):
    """Pure-JAX reference mirroring the PyTorch forward (per-quantile loop)."""
    t = jnp.ravel(target).astype(jnp.float32)
    p = jnp.ravel(preds).astype(jnp.float32)
    e = t - p
    total = jnp.zeros_like(e)
    for q in quantiles:
        q = float(q)
        total = total + jnp.maximum((q - 1.0) * e, q * e)
    return jnp.mean(total)


if __name__ == "__main__":
    key = jax.random.PRNGKey(0)
    k1, k2, k3, k4, k5, k6 = jax.random.split(key, 6)

    # Case 1: small f32, shapes matching the module's typical use (batch=2, seq=8, feat=16).
    q1 = [0.1, 0.5, 0.9]
    p1 = jax.random.normal(k1, (2, 8, 16), dtype=jnp.float32)
    t1 = jax.random.normal(k2, (2, 8, 16), dtype=jnp.float32)
    l1 = jax.block_until_ready(quantile_loss(p1, t1, q1))
    r1 = quantile_loss_ref(p1, t1, q1)
    assert jnp.allclose(l1, r1, rtol=1e-5, atol=1e-5), (l1, r1)

    # Case 2: f32, size not a multiple of 1024 and asymmetric quantiles
    # (exercises the ragged-tail mask and the |e|/e coefficient split).
    q2 = [0.1, 0.5, 0.95]
    p2 = jax.random.normal(k3, (4, 25, 50), dtype=jnp.float32)   # 5000 elements
    t2 = jax.random.normal(k4, (4, 25, 50), dtype=jnp.float32)
    l2 = jax.block_until_ready(quantile_loss(p2, t2, q2))
    r2 = quantile_loss_ref(p2, t2, q2)
    assert jnp.allclose(l2, r2, rtol=1e-4, atol=1e-5), (l2, r2)

    # Case 3: bf16 inputs DMA'd natively (cast to f32 inside the kernel).
    q3 = [0.25, 0.5, 0.75, 0.9]
    p3 = jax.random.normal(k5, (2, 128, 64), dtype=jnp.float32).astype(jnp.bfloat16)
    t3 = jax.random.normal(k6, (2, 128, 64), dtype=jnp.float32).astype(jnp.bfloat16)
    l3 = jax.block_until_ready(quantile_loss(p3, t3, q3))
    r3 = quantile_loss_ref(p3, t3, q3)
    assert jnp.allclose(l3, r3, rtol=1e-4, atol=1e-5), (l3, r3)

    print("KERNEL_OK")
</pallas_src>

<mosaic_0001>
module attributes {stable_mosaic.version = 11 : i64} {
  func.func @_quantile_loss_kernel(%arg0: i32, %arg1: memref<8x128xf32, #tpu.memory_space<vmem>>, %arg2: memref<8x128xf32, #tpu.memory_space<vmem>>, %arg3: memref<1x128xf32, #tpu.memory_space<vmem>>) attributes {dimension_semantics = [#tpu.dimension_semantics<parallel>], iteration_bounds = array<i64: 1>, scalar_prefetch = 0 : i64, scratch_operands = 0 : i64, tpu.core_type = #tpu.core_type<tc>, window_params = [{transform_indices = @transform_0, window_bounds = array<i64: 8, 128>}, {transform_indices = @transform_1, window_bounds = array<i64: 8, 128>}, {transform_indices = @transform_2, window_bounds = array<i64: 1, 128>}]} {
    %c0 = arith.constant 0 : index
    %c0_0 = arith.constant 0 : index
    %0 = vector.load %arg2[%c0, %c0_0] : memref<8x128xf32, #tpu.memory_space<vmem>>, vector<8x128xf32>
    %c0_1 = arith.constant 0 : index
    %c0_2 = arith.constant 0 : index
    %1 = vector.load %arg1[%c0_1, %c0_2] : memref<8x128xf32, #tpu.memory_space<vmem>>, vector<8x128xf32>
    %2 = arith.subf %0, %1 : vector<8x128xf32>
    %3 = math.absf %2 : vector<8x128xf32>
    %cst = arith.constant 1.500000e+00 : f32
    %4 = vector.broadcast %cst : f32 to vector<8x128xf32>
    %5 = arith.mulf %4, %3 : vector<8x128xf32>
    %cst_3 = arith.constant 0.000000e+00 : f32
    %6 = vector.broadcast %cst_3 : f32 to vector<8x128xf32>
    %7 = arith.mulf %6, %2 : vector<8x128xf32>
    %8 = arith.addf %5, %7 : vector<8x128xf32>
    %cst_4 = arith.constant dense<0.000000e+00> : vector<128xf32>
    %9 = vector.multi_reduction <add>, %8, %cst_4 [0] : vector<8x128xf32> to vector<128xf32>
    %10 = vector.shape_cast %9 : vector<128xf32> to vector<1x128xf32>
    %c0_5 = arith.constant 0 : index
    %c0_6 = arith.constant 0 : index
    %11 = vector.load %arg3[%c0_5, %c0_6] : memref<1x128xf32, #tpu.memory_space<vmem>>, vector<1x128xf32>
    tpu.vector_store %arg3[%c0_5, %c0_6], %10 {strides = array<i32>} : memref<1x128xf32, #tpu.memory_space<vmem>>, vector<1x128xf32>,
    return
  }
  func.func @transform_0(%arg0: i32) -> (i32, i32) {
    %c0_i32 = arith.constant 0 : i32
    %c0_i32_0 = arith.constant 0 : i32
    return %arg0, %c0_i32 : i32, i32
  }
  func.func @transform_1(%arg0: i32) -> (i32, i32) {
    %c0_i32 = arith.constant 0 : i32
    %c0_i32_0 = arith.constant 0 : i32
    return %arg0, %c0_i32 : i32, i32
  }
  func.func @transform_2(%arg0: i32) -> (i32, i32) {
    %c0_i32 = arith.constant 0 : i32
    %c0_i32_0 = arith.constant 0 : i32
    return %arg0, %c0_i32 : i32, i32
  }
}

</mosaic_0001>

<bundles_post_ra>
// kernel: tpu_custom_call.1
= control target key start
LH: loop header
LB: loop body
LE: loop exit
PB: predicated region body
PF: predicated region fallthrough
CT: control target
= control target key end

     0   :  { %7 = vsyncpa [#allocation3], 0  ;;  %s195_s0 = inlined_call_operand.hbm [shape: f32[8,128], index: 0, kind: input, shape index: {}]   ;;  %s196_s1 = inlined_call_operand.hbm [shape: f32[8,128], index: 1, kind: input, shape index: {}]   ;;  %s197_s2 = inlined_call_operand.hbm [shape: f32[1,128], index: 2, kind: output, shape index: {}]  }
   0x1   :  { %8 = vsyncpa [#allocation6], 0 }
   0x2   :  { %9 = vsyncpa [#allocation4], 0  ;;  %s141_s9 = smov [#allocation2]   ;;  %s142_s11 = smov [#allocation5]  }
   0x3   :  { %s16_s10 = sshll.u32 %s141_s9, 4  ;;  %s26_s12 = sshll.u32 %s142_s11, 4  ;;  %s17_s10 = int_to_ptr.vmem [resolvable:$true] %s16_s10  ;;  %s27_s12 = int_to_ptr.vmem [resolvable:$true] %s26_s12 }
   0x4   :  { %s69_s15 = scalar_lea.hbm %s195_s0, 128 }
   0x5   :  { %p70_p0 = scmp.ne.s32.totalorder %s195_s0, %s69_s15  ;;  %p73_p1 = scmp.lt.u32.totalorder %s69_s15, %s195_s0 }
   0x7   :  { %p75_p2 = pnand %p73_p1, %p70_p0 }
   0x9   :  { %78 = shalt.err (!%p75_p2)
}
   0xa   :  { %s79_s20 = scalar_lea.vmem %s17_s10, 128  ;;  %p84_p4 = scmp.lt.s32.totalorder %s17_s10, %s17_s10 }
   0xb   :  { %p80_p3 = scmp.ne.s32.totalorder %s17_s10, %s79_s20  ;;  %p85_p5 = scmp.lt.s32.totalorder %s79_s20, %s79_s20 }
   0xd   :  { %p86_p6 = por %p85_p5, %p84_p4 }
   0xf   :  { %p87_p7 = pnand %p86_p6, %p80_p3 }
  0x11   :  { %90 = shalt.err (!%p87_p7)
}
  0x12   :  { %19 = dma.hbm_to_vmem [thread:$0]  %s195_s0, 128, %s17_s10, [#allocation3]  }
  0x13   :  { %s91_s25 = scalar_lea.hbm %s196_s1, 128 }
  0x14   :  { %p92_p8 = scmp.ne.s32.totalorder %s196_s1, %s91_s25  ;;  %p95_p9 = scmp.lt.u32.totalorder %s91_s25, %s196_s1 }
  0x16   :  { %p97_p10 = pnand %p95_p9, %p92_p8 }
  0x18   :  { %100 = shalt.err (!%p97_p10)
}
  0x19   :  { %s101_s30 = scalar_lea.vmem %s27_s12, 128  ;;  %p106_p12 = scmp.lt.s32.totalorder %s27_s12, %s27_s12 }
  0x1a   :  { %p102_p11 = scmp.ne.s32.totalorder %s27_s12, %s101_s30  ;;  %p107_p13 = scmp.lt.s32.totalorder %s101_s30, %s101_s30 }
  0x1c   :  { %p108_p0 = por %p107_p13, %p106_p12 }
  0x1e   :  { %p109_p1 = pnand %p108_p0, %p102_p11 }
  0x20   :  { %112 = shalt.err (!%p109_p1)
}
  0x21   :  { %29 = dma.hbm_to_vmem [thread:$0]  %s196_s1, 128, %s27_s12, [#allocation6]  }
  0x22   :  { %135 = dma.done.wait [#allocation3], 128  }
  0x23   :  { %136 = vsyncadd [#allocation3], 4294967168 }
  0x24   :  { %137 = dma.done.wait [#allocation6], 128  }
  0x25   :  { %138 = vsyncadd [#allocation6], 4294967168  ;;  %v36_v0 = vld [vmem:[#allocation5] sm:$0xff]  ;;  %v37_v1 = vld [vmem:[#allocation2] sm:$0xff]  ;;  %s143_s4 = smov [#allocation7]  }
  0x26   :  { %v38_v2 = vsub.f32 %v36_v0, %v37_v1  ;;  %s56_s5 = sshll.u32 %s143_s4, 4  ;;  %s57_s5 = int_to_ptr.vmem [resolvable:$true] %s56_s5 }
  0x27   :  { %s113_s1 = scalar_lea.vmem %s57_s5, 16  ;;  %s117_s6 = scalar_lea.vmem %s57_s5, 32 }
  0x28   :  { %v39_v3 = vand.u32 2147483647, %v38_v2  ;;  %v41_v4 = vmul.f32 0.0, %v38_v2  ;;  %p114_p2 = scmp.ne.s32.totalorder %s57_s5, %s113_s1  ;;  %p118_p3 = scmp.lt.s32.totalorder %s57_s5, %s57_s5 }
  0x29   :  { %p119_p4 = scmp.lt.s32.totalorder %s117_s6, %s113_s1 }
  0x2a   :  { %v40_v5 = vmul.f32 1.5, %v39_v3 }
  0x2b   :  { %p120_p5 = por %p119_p4, %p118_p3 }
  0x2c   :  { %v42_v6 = vadd.f32 %v41_v4, %v40_v5 }
  0x2d   :  { %p121_p6 = pnand %p120_p5, %p114_p2 }
  0x2e   :  { %v43_v7 = vrot.slane %v42_v6, 4 }
  0x30   :  { %v44_v8 = vadd.f32 %v43_v7, %v42_v6 }
  0x32   :  { %v45_v9 = vrot.slane %v44_v8, 2 }
  0x34   :  { %v46_v10 = vadd.f32 %v45_v9, %v44_v8 }
  0x36   :  { %v47_v11 = vrot.slane %v46_v10, 1 }
  0x38   :  { %v48_v12 = vadd.f32 %v47_v11, %v46_v10 }
  0x3a   :  { %49 = vst [vmem:[#allocation7] sm:$0x1] %v48_v12 }
  0x3b   :  { %124 = shalt.err (!%p121_p6)
}
  0x3c   :  { %s125_s9 = scalar_lea.hbm %s197_s2, 16 }
  0x3d   :  { %p126_p7 = scmp.ne.s32.totalorder %s197_s2, %s125_s9  ;;  %p129_p8 = scmp.lt.u32.totalorder %s125_s9, %s197_s2 }
  0x3f   :  { %p131_p9 = pnand %p129_p8, %p126_p7 }
  0x41   :  { %134 = shalt.err (!%p131_p9)
}
  0x42   :  { %59 = dma.vmem_to_hbm [thread:$0]  %s57_s5, 16, %s197_s2, [#allocation4]  }
  0x43   :  { %139 = dma.done.wait [#allocation4], 16  }
  0x44   :  { %140 = vsyncadd [#allocation4], 4294967280 }
  0x45   :  { %63 = vsyncpa [#allocation3], 1 }
  0x46   :  { %64 = vsyncpa [#allocation6], 1 }
  0x47   :  { %65 = vsyncpa [#allocation4], 1 }

</bundles_post_ra>
